<compile_context>
chip_gen: v6e
topology: v6e:2x2x1
jax: 0.10.0
libtpu: 0.0.40
codegen_flags: <defaults>
</compile_context>

<pallas_src>
import jax
import jax.numpy as jnp
from jax.experimental import pallas as pl
from jax.experimental.pallas import tpu as pltpu

LN_EPS = 1e-5  # torch.nn.LayerNorm default


def _round_up(v, m):
    return (v + m - 1) // m * m


def _pick_row_tile(n, tile_rows):
    """Row tile: multiple of 8, <= tile_rows, with minimal padding for ragged N."""
    tm = min(tile_rows, _round_up(n, 8))
    n_tiles = pl.cdiv(n, tm)
    # Re-balance: keep the same number of tiles but shrink the tile so the
    # padded tail is < 8 rows instead of up to (tm - 1) rows.
    tm = _round_up(pl.cdiv(n, n_tiles), 8)
    return tm, n_tiles * tm


def _pick_col_tile(hout, tile_cols):
    # Largest multiple of 128 (<= tile_cols) that evenly divides Hout; else whole Hout.
    for cand in range(tile_cols, 127, -128):
        if hout % cand == 0:
            return cand
    return hout


def _proj_kernel(x_ref, gamma_ref, beta_ref, w_ref, b_ref, o_ref, xn_ref):
    # x_ref: (TM, H)   gamma/beta: (1, H) f32   w_ref: (H, TN) bf16
    # b_ref: (1, TN) f32   o_ref: (TM, TN)   xn_ref: (TM, H) bf16 scratch

    # --- LayerNorm (f32 stats, biased variance) once per row tile ---
    @pl.when(pl.program_id(1) == 0)
    def _():
        x = x_ref[...].astype(jnp.float32)
        mean = jnp.mean(x, axis=-1, keepdims=True)
        xc = x - mean
        var = jnp.mean(xc * xc, axis=-1, keepdims=True)
        inv = jax.lax.rsqrt(var + LN_EPS)
        xn = xc * inv * gamma_ref[...].astype(jnp.float32) \
             + beta_ref[...].astype(jnp.float32)
        xn_ref[...] = xn.astype(xn_ref.dtype)

    # --- Linear: bf16 operands into the MXU, f32 accumulation ---
    y = jnp.dot(xn_ref[...], w_ref[...], preferred_element_type=jnp.float32)
    y = y + b_ref[...].astype(jnp.float32)
    o_ref[...] = y.astype(o_ref.dtype)


def proj_layer(x, gamma, beta, w, b, *, tile_rows=256, tile_cols=512):
    """x: (B, S, H). w: (H, scale*H) (in, out). Returns (B, S, scale*H) in x.dtype."""
    B, S, H = x.shape
    Hout = w.shape[1]
    N = B * S

    TM, N_pad = _pick_row_tile(N, tile_rows)
    TN = _pick_col_tile(Hout, tile_cols)

    x2 = x.reshape(N, H)
    if N_pad != N:
        x2 = jnp.pad(x2, ((0, N_pad - N), (0, 0)))  # zero rows are LN-safe, cropped later

    gamma2 = gamma.reshape(1, H).astype(jnp.float32)
    beta2 = beta.reshape(1, H).astype(jnp.float32)
    w_bf16 = w.astype(jnp.bfloat16)                 # halve weight HBM/VMEM traffic
    b2 = b.reshape(1, Hout).astype(jnp.float32)

    grid = (N_pad // TM, Hout // TN)

    # VMEM budget: double-buffered pipelined operands + scratch, with headroom.
    xdt = x.dtype.itemsize
    need = (2 * TM * H * xdt            # x tile
            + 2 * H * TN * 2            # weight tile (bf16)
            + 2 * TM * TN * xdt         # output tile
            + 4 * H * 4 + 2 * TN * 4    # gamma, beta, bias
            + TM * H * 2)               # xn scratch (bf16)
    vmem_limit = int(min(64 * 1024 * 1024, max(2 * need, 32 * 1024 * 1024)))

    cost = pl.CostEstimate(
        flops=2 * N_pad * H * Hout,
        transcendentals=N_pad,  # one rsqrt per row
        bytes_accessed=N_pad * H * xdt + H * Hout * 2 + N_pad * Hout * xdt,
    )

    out = pl.pallas_call(
        _proj_kernel,
        out_shape=jax.ShapeDtypeStruct((N_pad, Hout), x.dtype),
        grid_spec=pltpu.PrefetchScalarGridSpec(
            num_scalar_prefetch=0,
            grid=grid,
            in_specs=[
                pl.BlockSpec((TM, H), lambda i, j: (i, 0)),   # x rows (resident across j)
                pl.BlockSpec((1, H), lambda i, j: (0, 0)),    # gamma
                pl.BlockSpec((1, H), lambda i, j: (0, 0)),    # beta
                pl.BlockSpec((H, TN), lambda i, j: (0, j)),   # weight column slab
                pl.BlockSpec((1, TN), lambda i, j: (0, j)),   # bias column slab
            ],
            out_specs=pl.BlockSpec((TM, TN), lambda i, j: (i, j)),
            scratch_shapes=[pltpu.VMEM((TM, H), jnp.bfloat16)],
        ),
        compiler_params=pltpu.CompilerParams(
            dimension_semantics=("parallel", "arbitrary"),
            vmem_limit_bytes=vmem_limit,
        ),
        cost_estimate=cost,
    )(x2, gamma2, beta2, w_bf16, b2)

    if N_pad != N:
        out = out[:N]
    return out.reshape(B, S, Hout)


def reference(x, gamma, beta, w, b):
    mean = jnp.mean(x, axis=-1, keepdims=True)
    var = jnp.mean((x - mean) ** 2, axis=-1, keepdims=True)
    xn = (x - mean) * jax.lax.rsqrt(var + LN_EPS) * gamma + beta
    return xn @ w + b


if __name__ == "__main__":
    B, S, H = 2, 8, 32
    scale_factor = 4
    Hout = scale_factor * H

    key = jax.random.PRNGKey(0)
    kx, kw, kb = jax.random.split(key, 3)

    x = jax.random.normal(kx, (B, S, H), dtype=jnp.float32)

    # Deterministic parameters matching the PyTorch module __init__ shapes.
    gamma = jnp.ones((H,), dtype=jnp.float32)          # nn.LayerNorm weight
    beta = jnp.zeros((H,), dtype=jnp.float32)          # nn.LayerNorm bias
    bound = 1.0 / (H ** 0.5)
    # nn.Linear stores (out, in); we keep (in, out) for x @ w.
    w = jax.random.uniform(kw, (H, Hout), dtype=jnp.float32,
                           minval=-bound, maxval=bound)
    b = jax.random.uniform(kb, (Hout,), dtype=jnp.float32,
                           minval=-bound, maxval=bound)

    y = proj_layer(x, gamma, beta, w, b)
    y = jax.block_until_ready(y)

    y_ref = reference(x, gamma, beta, w, b)
    assert y.shape == (B, S, Hout)
    # bf16 MXU operands with f32 accumulation -> slightly looser tolerance vs f32 ref.
    err = float(jnp.max(jnp.abs(y - y_ref)))
    assert jnp.allclose(y, y_ref, atol=3e-2, rtol=3e-2), f"max abs err {err}"

    print("KERNEL_OK")
</pallas_src>

<mosaic_0001>
module attributes {stable_mosaic.version = 11 : i64} {
  func.func @_proj_kernel(%arg0: i32, %arg1: i32, %arg2: memref<16x32xf32, #tpu.memory_space<vmem>>, %arg3: memref<1x32xf32, #tpu.memory_space<vmem>>, %arg4: memref<1x32xf32, #tpu.memory_space<vmem>>, %arg5: memref<32x128xbf16, #tpu.memory_space<vmem>>, %arg6: memref<1x128xf32, #tpu.memory_space<vmem>>, %arg7: memref<16x128xf32, #tpu.memory_space<vmem>>, %arg8: memref<16x32xbf16, #tpu.memory_space<vmem>>) attributes {dimension_semantics = [#tpu.dimension_semantics<parallel>, #tpu.dimension_semantics<arbitrary>], iteration_bounds = array<i64: 1, 1>, scalar_prefetch = 0 : i64, scratch_operands = 1 : i64, tpu.core_type = #tpu.core_type<tc>, window_params = [{transform_indices = @transform_0, window_bounds = array<i64: 16, 32>}, {pipeline_mode = #tpu.pipeline_mode<synchronous>, transform_indices = @transform_1, window_bounds = array<i64: 1, 32>}, {pipeline_mode = #tpu.pipeline_mode<synchronous>, transform_indices = @transform_2, window_bounds = array<i64: 1, 32>}, {transform_indices = @transform_3, window_bounds = array<i64: 32, 128>}, {transform_indices = @transform_4, window_bounds = array<i64: 1, 128>}, {transform_indices = @transform_5, window_bounds = array<i64: 16, 128>}]} {
    %c0_i32 = arith.constant 0 : i32
    %0 = arith.cmpi eq, %arg1, %c0_i32 : i32
    %1 = arith.extui %0 : i1 to i32
    %c0_i32_0 = arith.constant 0 : i32
    %2 = arith.cmpi ne, %1, %c0_i32_0 : i32
    scf.if %2 {
      %c0_8 = arith.constant 0 : index
      %c0_9 = arith.constant 0 : index
      %10 = vector.load %arg2[%c0_8, %c0_9] : memref<16x32xf32, #tpu.memory_space<vmem>>, vector<16x32xf32>
      %cst_10 = arith.constant dense<0.000000e+00> : vector<16xf32>
      %11 = vector.multi_reduction <add>, %10, %cst_10 [1] : vector<16x32xf32> to vector<16xf32>
      %12 = vector.shape_cast %11 : vector<16xf32> to vector<16x1xf32>
      %cst_11 = arith.constant 3.200000e+01 : f32
      %13 = vector.broadcast %cst_11 : f32 to vector<16x1xf32>
      %14 = arith.divf %12, %13 : vector<16x1xf32>
      %15 = vector.broadcast %14 : vector<16x1xf32> to vector<16x32xf32>
      %16 = arith.subf %10, %15 : vector<16x32xf32>
      %17 = arith.mulf %16, %16 : vector<16x32xf32>
      %cst_12 = arith.constant dense<0.000000e+00> : vector<16xf32>
      %18 = vector.multi_reduction <add>, %17, %cst_12 [1] : vector<16x32xf32> to vector<16xf32>
      %19 = vector.shape_cast %18 : vector<16xf32> to vector<16x1xf32>
      %cst_13 = arith.constant 3.200000e+01 : f32
      %20 = vector.broadcast %cst_13 : f32 to vector<16x1xf32>
      %21 = arith.divf %19, %20 : vector<16x1xf32>
      %cst_14 = arith.constant 9.99999974E-6 : f32
      %22 = vector.broadcast %cst_14 : f32 to vector<16x1xf32>
      %23 = arith.addf %21, %22 : vector<16x1xf32>
      %24 = math.rsqrt %23 : vector<16x1xf32>
      %25 = vector.broadcast %24 : vector<16x1xf32> to vector<16x32xf32>
      %26 = arith.mulf %16, %25 : vector<16x32xf32>
      %c0_15 = arith.constant 0 : index
      %c0_16 = arith.constant 0 : index
      %27 = vector.load %arg3[%c0_15, %c0_16] : memref<1x32xf32, #tpu.memory_space<vmem>>, vector<1x32xf32>
      %28 = vector.broadcast %27 : vector<1x32xf32> to vector<16x32xf32>
      %29 = arith.mulf %26, %28 : vector<16x32xf32>
      %c0_17 = arith.constant 0 : index
      %c0_18 = arith.constant 0 : index
      %30 = vector.load %arg4[%c0_17, %c0_18] : memref<1x32xf32, #tpu.memory_space<vmem>>, vector<1x32xf32>
      %31 = vector.broadcast %30 : vector<1x32xf32> to vector<16x32xf32>
      %32 = arith.addf %29, %31 : vector<16x32xf32>
      %33 = arith.truncf %32 : vector<16x32xf32> to vector<16x32xbf16>
      %c0_19 = arith.constant 0 : index
      %c0_20 = arith.constant 0 : index
      %34 = vector.load %arg8[%c0_19, %c0_20] : memref<16x32xbf16, #tpu.memory_space<vmem>>, vector<16x32xbf16>
      tpu.vector_store %arg8[%c0_19, %c0_20], %33 {strides = array<i32>} : memref<16x32xbf16, #tpu.memory_space<vmem>>, vector<16x32xbf16>,
    } else {
    }
    %c0 = arith.constant 0 : index
    %c0_1 = arith.constant 0 : index
    %3 = vector.load %arg8[%c0, %c0_1] : memref<16x32xbf16, #tpu.memory_space<vmem>>, vector<16x32xbf16>
    %c0_2 = arith.constant 0 : index
    %c0_3 = arith.constant 0 : index
    %4 = vector.load %arg5[%c0_2, %c0_3] : memref<32x128xbf16, #tpu.memory_space<vmem>>, vector<32x128xbf16>
    %cst = arith.constant dense<0.000000e+00> : vector<16x128xf32>
    %5 = tpu.matmul %3, %4, %cst {dimension_numbers = #tpu.dot_dimension_numbers<[1], [0], [0], [1], [0, 0, 1, 1], [], []>} : vector<16x32xbf16>, vector<32x128xbf16>, vector<16x128xf32> -> vector<16x128xf32>
    %c0_4 = arith.constant 0 : index
    %c0_5 = arith.constant 0 : index
    %6 = vector.load %arg6[%c0_4, %c0_5] : memref<1x128xf32, #tpu.memory_space<vmem>>, vector<1x128xf32>
    %7 = vector.broadcast %6 : vector<1x128xf32> to vector<16x128xf32>
    %8 = arith.addf %5, %7 : vector<16x128xf32>
    %c0_6 = arith.constant 0 : index
    %c0_7 = arith.constant 0 : index
    %9 = vector.load %arg7[%c0_6, %c0_7] : memref<16x128xf32, #tpu.memory_space<vmem>>, vector<16x128xf32>
    tpu.vector_store %arg7[%c0_6, %c0_7], %8 {strides = array<i32>} : memref<16x128xf32, #tpu.memory_space<vmem>>, vector<16x128xf32>,
    return
  }
  func.func @transform_0(%arg0: i32, %arg1: i32) -> (i32, i32) {
    %c0_i32 = arith.constant 0 : i32
    %c0_i32_0 = arith.constant 0 : i32
    return %arg0, %c0_i32 : i32, i32
  }
  func.func @transform_1(%arg0: i32, %arg1: i32) -> (i32, i32) {
    %c0_i32 = arith.constant 0 : i32
    %c0_i32_0 = arith.constant 0 : i32
    %c0_i32_1 = arith.constant 0 : i32
    return %c0_i32, %c0_i32_0 : i32, i32
  }
  func.func @transform_2(%arg0: i32, %arg1: i32) -> (i32, i32) {
    %c0_i32 = arith.constant 0 : i32
    %c0_i32_0 = arith.constant 0 : i32
    %c0_i32_1 = arith.constant 0 : i32
    return %c0_i32, %c0_i32_0 : i32, i32
  }
  func.func @transform_3(%arg0: i32, %arg1: i32) -> (i32, i32) {
    %c0_i32 = arith.constant 0 : i32
    %c0_i32_0 = arith.constant 0 : i32
    return %c0_i32, %arg1 : i32, i32
  }
  func.func @transform_4(%arg0: i32, %arg1: i32) -> (i32, i32) {
    %c0_i32 = arith.constant 0 : i32
    %c0_i32_0 = arith.constant 0 : i32
    return %c0_i32, %arg1 : i32, i32
  }
  func.func @transform_5(%arg0: i32, %arg1: i32) -> (i32, i32) {
    %c0_i32 = arith.constant 0 : i32
    return %arg0, %arg1 : i32, i32
  }
}

</mosaic_0001>

<bundles_post_ra>
// kernel: tpu_custom_call.1
= control target key start
LH: loop header
LB: loop body
LE: loop exit
PB: predicated region body
PF: predicated region fallthrough
CT: control target
= control target key end

     0   :  { %10 = vsyncpa [#allocation4], 0  ;;  %s380_s0 = inlined_call_operand.hbm [shape: f32[16,32], index: 0, kind: input, shape index: {}]   ;;  %s381_s1 = inlined_call_operand.vmem [shape: f32[1,32], index: 1, kind: input, shape index: {}]   ;;  %s382_s2 = inlined_call_operand.vmem [shape: f32[1,32], index: 2, kind: input, shape index: {}]   ;;  %s383_s3 = inlined_call_operand.hbm [shape: bf16[32,128], index: 3, kind: input, shape index: {}]   ;;  %s384_s4 = inlined_call_operand.vmem [shape: f32[1,128], index: 4, kind: input, shape index: {}]   ;;  %s385_s5 = inlined_call_operand.hbm [shape: f32[16,128], index: 5, kind: output, shape index: {}]  }
   0x1   :  { %11 = vsyncpa [#allocation7], 0 }
   0x2   :  { %12 = vsyncpa [#allocation5], 0  ;;  %s312_s18 = smov [#allocation3]  }
   0x3   :  { %s18_s19 = sshll.u32 %s312_s18, 4  ;;  %s19_s19 = int_to_ptr.vmem [resolvable:$true] %s18_s19 }
   0x4   :  { %s254_s20 = scalar_lea.vmem %s19_s19, 256  ;;  %p259_p1 = scmp.lt.s32.totalorder %s19_s19, %s19_s19 }
   0x5   :  { %p255_p0 = scmp.ne.s32.totalorder %s19_s19, %s254_s20  ;;  %p260_p2 = scmp.lt.s32.totalorder %s254_s20, %s254_s20 }
   0x7   :  { %p261_p3 = por %p260_p2, %p259_p1 }
   0x9   :  { %p262_p4 = pnand %p261_p3, %p255_p0 }
   0xb   :  { %265 = shalt.err (!%p262_p4)
}
   0xc   :  { %s313_s21 = smov 128   ;;  %s314_s22 = smov 8  }
   0xd   :  { %24 = dma.hbm_to_vmem [thread:$0]  %s380_s0, 256, %s19_s19, [#allocation4], %s313_s21, %s313_s21, %s314_s22  }
   0xe   :  { %s315_s25 = smov [#allocation6]  }
   0xf   :  { %s34_s26 = sshll.u32 %s315_s25, 4  ;;  %s35_s26 = int_to_ptr.vmem [resolvable:$true] %s34_s26 }
  0x10   :  { %s274_s27 = scalar_lea.vmem %s35_s26, 256  ;;  %p279_p6 = scmp.lt.s32.totalorder %s35_s26, %s35_s26 }
  0x11   :  { %p275_p5 = scmp.ne.s32.totalorder %s35_s26, %s274_s27  ;;  %p280_p7 = scmp.lt.s32.totalorder %s274_s27, %s274_s27 }
  0x13   :  { %p281_p8 = por %p280_p7, %p279_p6 }
  0x15   :  { %p282_p9 = pnand %p281_p8, %p275_p5 }
  0x17   :  { %285 = shalt.err (!%p282_p9)
}
  0x18   :  { %s316_s28 = smov 64   ;;  %s317_s29 = smov 4  }
  0x19   :  { %40 = dma.hbm_to_vmem [thread:$0]  %s383_s3, 256, %s35_s26, [#allocation7], %s316_s28, %s316_s28, %s317_s29  }
  0x1a   :  { %306 = dma.done.wait [#allocation4], 256  }
  0x1b   :  { %307 = vsyncadd [#allocation4], 4294967040 }
  0x1c   :  { %308 = dma.done.wait [#allocation7], 256  }
  0x1d   :  { %309 = vsyncadd [#allocation7], 4294967040  ;;  %vm56_vm0 = vcmask 261120   ;;  %v54_v0 = vld [vmem:[#allocation3] sm:$0xff]  ;;  %v55_v1 = vld [vmem:[#allocation3 + $0x8] sm:$0xff]  ;;  %v318_v15 = vmov 0.0  }
  0x1e   :  { %v57_v2 = vsel %vm56_vm0, %v54_v0, 0.0  ;;  %v60_v3 = vsel %vm56_vm0, %v55_v1, 0.0  ;;  %v239_v14 = vld [vmem:[#allocation6 + $0x8] sm:$0xff]   ;;  %222 = vmatprep.subr.bf16.mxu0 %v318_v15  ;;  %vm319_vm1 = vmmov 0   ;;  %v240_v16 = vld [vmem:[#allocation6] sm:$0xff]   ;;  %vm110_vm2 = vcmask 257024  }
  0x1f   :  { %58 = vadd.xlane.f32.xlu0 %v57_v2  ;;  %226 = vmatprep.mubr.msk.bf16.mxu0 %vm319_vm1, %v318_v15  ;;  %v208_v24 = vld [vmem:[%s381_s1] ss:$0 sm:$0xff] }
  0x20   :  { %223 = vmatpush3.bf16.msra.mxu0 %v239_v14  ;;  %v209_v26 = vld [vmem:[%s382_s2] ss:$0 sm:$0xff]  ;;  %s320_s2 = smov [#allocation8]  }
  0x21   :  { %224 = vmatprep.subr.bf16.mxu0 %v318_v15  ;;  %v212_v36 = vld [vmem:[%s384_s4] ss:$0 sm:$0xff]  ;;  %s195_s10 = sshll.u32 %s320_s2, 4  ;;  %s196_s10 = int_to_ptr.vmem [resolvable:$true] %s195_s10 }
  0x22   :  { %s286_s11 = scalar_lea.vmem %s196_s10, 256  ;;  %p291_p11 = scmp.lt.s32.totalorder %s196_s10, %s196_s10 }
  0x23   :  { %61 = vadd.xlane.f32.xlu0 %v60_v3  ;;  %p287_p10 = scmp.ne.s32.totalorder %s196_s10, %s286_s11  ;;  %p292_p12 = scmp.lt.s32.totalorder %s286_s11, %s286_s11 }
  0x24   :  { %225 = vmatpush3.bf16.msra.mxu0 %v240_v16 }
  0x25   :  { %p293_p13 = por %p292_p12, %p291_p11 }
  0x27   :  { %p294_p0 = pnand %p293_p13, %p287_p10 }
  0xa8   :  { %v59_v4 = vpop.xlane.xlu0 %58 }
  0xa9   :  { %v64_v5 = vmul.f32 0.03125, %v59_v4 }
  0xab   :  { %v66_v6 = vsub.f32 %v54_v0, %v64_v5 }
  0xac   :  { %v62_v7 = vpop.xlane.xlu0 %61 }
  0xad   :  { %v65_v8 = vmul.f32 0.03125, %v62_v7  ;;  %v68_v9 = vmul.f32 %v66_v6, %v66_v6 }
  0xaf   :  { %v67_v10 = vsub.f32 %v55_v1, %v65_v8  ;;  %v70_v11 = vsel %vm56_vm0, %v68_v9, 0.0 }
  0xb0   :  { %71 = vadd.xlane.f32.xlu1 %v70_v11 }
  0xb1   :  { %v69_v12 = vmul.f32 %v67_v10, %v67_v10 }
  0xb3   :  { %v73_v13 = vsel %vm56_vm0, %v69_v12, 0.0 }
  0xb4   :  { %74 = vadd.xlane.f32.xlu1 %v73_v13 }
 0x139   :  { %v72_v17 = vpop.xlane.xlu1 %71 }
 0x13a   :  { %v76_v18 = vmul.f32 0.03125, %v72_v17 }
 0x13c   :  { %v78_v19 = vadd.f32 1e-05, %v76_v18 }
 0x13d   :  { %v75_v20 = vpop.xlane.xlu1 %74 }
 0x13e   :  { %242 = vrsqrt.f32 %v78_v19  ;;  %v77_v21 = vmul.f32 0.03125, %v75_v20 }
 0x140   :  { %v79_v22 = vadd.f32 1e-05, %v77_v21 }
 0x142   :  { %244 = vrsqrt.f32 %v79_v22 }
 0x14b   :  { %v243_v23 = vpop.eup %242 }
 0x14c   :  { %v82_v25 = vmul.f32 %v243_v23, %v66_v6 }
 0x14e   :  { %v91_v27 = vmul.f32 %v208_v24, %v82_v25 }
 0x14f   :  { %v245_v28 = vpop.eup %244 }
 0x150   :  { %v100_v29 = vadd.f32 %v209_v26, %v91_v27  ;;  %v83_v30 = vmul.f32 %v245_v28, %v67_v10 }
 0x152   :  { %v217_v31 = vpack.c.bf16 %v100_v29, %v100_v29  ;;  %v92_v32 = vmul.f32 %v208_v24, %v83_v30 }
 0x154   :  { %111 = vst.msk [vmem:[#allocation2] sm:$0xf] %vm110_vm2, %v217_v31  ;;  %v101_v33 = vadd.f32 %v209_v26, %v92_v32 }
 0x156   :  { %v218_v34 = vpack.c.bf16 %v101_v33, %v101_v33 }
 0x158   :  { %112 = vst.msk [vmem:[#allocation2 + $0x4] sm:$0xf] %vm110_vm2, %v218_v34 }
 0x15f   :  { %v241_v35 = vld [vmem:[#allocation2] sm:$0xff]  }
 0x160   :  { %227 = vmatmul.mubr.msk.bf16.vlgmr.msra.gmra.mxu0 %vm56_vm0, %v241_v35 }
 0x220   :  { %v181_v37 = vpop.f32.mrf.mxu0 }
 0x221   :  { %v182_v38 = vadd.f32 %v212_v36, %v181_v37 }
 0x222   :  { %v228_v39 = vpop.f32.mrf.mxu0 }
 0x223   :  { %188 = vst [vmem:[#allocation8] sm:$0xff] %v182_v38 }
 0x224   :  { %v184_v40 = vpop.f32.mrf.mxu0 }
 0x225   :  { %v185_v41 = vadd.f32 %v212_v36, %v184_v40 }
 0x226   :  { %v229_v42 = vpop.f32.mrf.mxu0 }
 0x227   :  { %189 = vst [vmem:[#allocation8 + $0x8] sm:$0xff] %v185_v41 }
 0x228   :  { %297 = shalt.err (!%p294_p0)
}
 0x229   :  { %201 = dma.vmem_to_hbm [thread:$0]  %s196_s10, 256, %s385_s5, [#allocation5], %s313_s21, %s313_s21, %s314_s22  }
 0x22a   :  { %310 = dma.done.wait [#allocation5], 256  }
 0x22b   :  { %311 = vsyncadd [#allocation5], 4294967040 }
 0x22c   :  { %205 = vsyncpa [#allocation4], 1 }
 0x22d   :  { %206 = vsyncpa [#allocation7], 1 }
 0x22e   :  { %207 = vsyncpa [#allocation5], 1 }

</bundles_post_ra>
